<compile_context>
chip_gen: v7x
topology: tpu7x:2x2x1
jax: 0.10.0
libtpu: 0.0.40
codegen_flags: <defaults>
</compile_context>

<pallas_src>
import functools

import jax
import jax.numpy as jnp
from jax.experimental import pallas as pl
from jax.experimental.pallas import tpu as pltpu


# ----------------------------- kernels -----------------------------

def _reduce_kernel(data_ref, obs_ref, ts_sum_ref, n_obs_ref):
    # data_ref/obs_ref: (B, tile_s, C); ts_sum_ref/n_obs_ref: (B, 1, C) resident accumulators.
    @pl.when(pl.program_id(0) == 0)
    def _():
        ts_sum_ref[...] = jnp.zeros_like(ts_sum_ref)
        n_obs_ref[...] = jnp.zeros_like(n_obs_ref)

    d = data_ref[...].astype(jnp.float32)
    o = obs_ref[...].astype(jnp.float32)
    ts_sum_ref[...] += jnp.sum(jnp.abs(d * o), axis=1, keepdims=True)
    n_obs_ref[...] += jnp.sum(o, axis=1, keepdims=True)


def _combine_kernel(ts_sum_ref, n_obs_ref, scale_ref, *, minimum_scale):
    # All refs: (B, 1, C).  Tiny; runs once.
    ts_sum = ts_sum_ref[...]
    n_obs = n_obs_ref[...]

    per_series = ts_sum / jnp.maximum(n_obs, 1.0)

    # default_scale from the whole batch (used where a series has no observations).
    batch_sum = jnp.sum(ts_sum, axis=0, keepdims=True)                 # (1,1,C)
    batch_obs = jnp.maximum(jnp.sum(n_obs, axis=0, keepdims=True), 1.0)
    default_scale = batch_sum / batch_obs

    scale = jnp.where(n_obs > 0.0, per_series, default_scale)
    scale_ref[...] = jnp.maximum(scale, jnp.float32(minimum_scale))


def _apply_kernel(data_ref, scale_ref, out_ref):
    # data_ref: (B, tile_s, C); scale_ref: (B, 1, C) broadcast along the sequence axis.
    # Exact division (matches torch's `data / scale`); the pass is memory-bound anyway.
    x = data_ref[...].astype(jnp.float32)
    out_ref[...] = (x / scale_ref[...]).astype(out_ref.dtype)


# ----------------------------- wrapper -----------------------------

def _round_up(x, m):
    return (x + m - 1) // m * m


def _pick_tile_s(seq_len, batch, channels, itemsize, max_block_bytes=8 << 20):
    # Largest sequence tile (multiple of 8 sublanes) whose (B, tile_s, C) block stays under
    # the budget -- big tiles push this mem-bound kernel toward the HBM roofline while
    # leaving plenty of headroom under the scoped VMEM default on v5e/v6e/v7x.
    cap = max(8, (max_block_bytes // max(1, batch * channels * itemsize)) // 8 * 8)
    return int(min(_round_up(seq_len, 8), cap))


def mean_scaler(data, observed_indicator, *, minimum_scale=1e-10):
    """
    data:               (batch, seq_len, num_channels)
    observed_indicator: (batch, seq_len, num_channels)  0/1 mask (float)
    returns: (scaled_data, loc (zeros), scale) with scale shape (batch, 1, num_channels)
    """
    assert data.shape == observed_indicator.shape, "data / observed_indicator shape mismatch"
    B, S, C = data.shape

    tile_s = _pick_tile_s(S, B, C, jnp.dtype(data.dtype).itemsize)
    S_pad = _round_up(S, tile_s)
    if S_pad != S:
        # Zero padding along the sequence axis is neutral for both reductions.
        pad = ((0, 0), (0, S_pad - S), (0, 0))
        data_p = jnp.pad(data, pad)
        obs_p = jnp.pad(observed_indicator, pad)
    else:
        data_p, obs_p = data, observed_indicator

    grid = (S_pad // tile_s,)

    # ---- pass 1: masked abs-sum + observation count, reduced over the sequence axis ----
    ts_sum, n_obs = pl.pallas_call(
        _reduce_kernel,
        out_shape=(
            jax.ShapeDtypeStruct((B, 1, C), jnp.float32),
            jax.ShapeDtypeStruct((B, 1, C), jnp.float32),
        ),
        grid=grid,
        in_specs=[
            pl.BlockSpec((B, tile_s, C), lambda s: (0, s, 0)),
            pl.BlockSpec((B, tile_s, C), lambda s: (0, s, 0)),
        ],
        out_specs=(
            pl.BlockSpec((B, 1, C), lambda s: (0, 0, 0)),
            pl.BlockSpec((B, 1, C), lambda s: (0, 0, 0)),
        ),
        compiler_params=pltpu.CompilerParams(
            dimension_semantics=("arbitrary",),  # accumulation axis
        ),
    )(data_p, obs_p)

    # ---- pass 2: per-series scale + cross-batch default fallback (tiny, single block) ----
    scale = pl.pallas_call(
        functools.partial(_combine_kernel, minimum_scale=minimum_scale),
        out_shape=jax.ShapeDtypeStruct((B, 1, C), jnp.float32),
        grid=(1,),
        in_specs=[
            pl.BlockSpec((B, 1, C), lambda i: (0, 0, 0)),
            pl.BlockSpec((B, 1, C), lambda i: (0, 0, 0)),
        ],
        out_specs=pl.BlockSpec((B, 1, C), lambda i: (0, 0, 0)),
        compiler_params=pltpu.CompilerParams(
            dimension_semantics=("arbitrary",),
        ),
    )(ts_sum, n_obs)

    # ---- pass 3: scaled_data = data / scale (dominant HBM traffic; parallel grid axis) ----
    scaled_p = pl.pallas_call(
        _apply_kernel,
        out_shape=jax.ShapeDtypeStruct((B, S_pad, C), data.dtype),
        grid=grid,
        in_specs=[
            pl.BlockSpec((B, tile_s, C), lambda s: (0, s, 0)),
            pl.BlockSpec((B, 1, C), lambda s: (0, 0, 0)),
        ],
        out_specs=pl.BlockSpec((B, tile_s, C), lambda s: (0, s, 0)),
        compiler_params=pltpu.CompilerParams(
            dimension_semantics=("parallel",),  # megacore sharding on v7x
        ),
    )(data_p, scale)

    scaled = scaled_p[:, :S, :] if S_pad != S else scaled_p

    scale = scale.astype(data.dtype)
    # loc is identically zero in the torch module (torch.zeros_like(scale)); no kernel needed.
    return scaled, jnp.zeros_like(scale), scale


# ----------------------------- reference + test -----------------------------

def _reference(data, observed_indicator, minimum_scale=1e-10):
    ts_sum = jnp.sum(jnp.abs(data * observed_indicator), axis=1, keepdims=True)
    num_observed = jnp.sum(observed_indicator, axis=1, keepdims=True)
    scale = ts_sum / jnp.maximum(num_observed, 1.0)
    batch_sum = jnp.sum(ts_sum, axis=0)
    batch_obs = jnp.maximum(jnp.sum(num_observed, axis=0), 1.0)
    default_scale = jnp.squeeze(batch_sum / batch_obs)
    scale = jnp.where(num_observed > 0, scale, default_scale)
    scale = jnp.maximum(scale, minimum_scale)
    scaled = data / scale
    return scaled, jnp.zeros_like(scale), scale


if __name__ == "__main__":
    key = jax.random.PRNGKey(0)
    k_data, k_obs = jax.random.split(key)

    # (batch_size, sequence_length, num_input_channels) per the module contract.
    B, S, C = 2, 64, 8
    data = jax.random.normal(k_data, (B, S, C), dtype=jnp.float32)
    observed = (jax.random.uniform(k_obs, (B, S, C)) < 0.8).astype(jnp.float32)
    # Force one (batch, channel) series to be fully unobserved to exercise the
    # default_scale / where() fallback path.
    observed = observed.at[0, :, 2].set(0.0)

    scaled, loc, scale = mean_scaler(data, observed)
    (scaled, loc, scale) = jax.block_until_ready((scaled, loc, scale))

    ref_scaled, ref_loc, ref_scale = _reference(data, observed)

    assert scaled.shape == data.shape
    assert scale.shape == (B, 1, C) and loc.shape == (B, 1, C)
    assert jnp.allclose(scale, ref_scale, atol=1e-5, rtol=1e-5), float(
        jnp.max(jnp.abs(scale - ref_scale)))
    assert jnp.allclose(scaled, ref_scaled, atol=1e-4, rtol=1e-5), float(
        jnp.max(jnp.abs(scaled - ref_scaled)))
    assert jnp.array_equal(loc, ref_loc)

    print("KERNEL_OK")
</pallas_src>

<mosaic_0001>
module attributes {stable_mosaic.version = 11 : i64} {
  func.func @_reduce_kernel(%arg0: i32, %arg1: memref<2x64x8xf32, #tpu.memory_space<vmem>>, %arg2: memref<2x64x8xf32, #tpu.memory_space<vmem>>, %arg3: memref<2x1x8xf32, #tpu.memory_space<vmem>>, %arg4: memref<2x1x8xf32, #tpu.memory_space<vmem>>) attributes {dimension_semantics = [#tpu.dimension_semantics<arbitrary>], iteration_bounds = array<i64: 1>, scalar_prefetch = 0 : i64, scratch_operands = 0 : i64, tpu.core_type = #tpu.core_type<tc>, window_params = [{transform_indices = @transform_0, window_bounds = array<i64: 2, 64, 8>}, {transform_indices = @transform_1, window_bounds = array<i64: 2, 64, 8>}, {pipeline_mode = #tpu.pipeline_mode<synchronous>, transform_indices = @transform_2, window_bounds = array<i64: 2, 1, 8>}, {pipeline_mode = #tpu.pipeline_mode<synchronous>, transform_indices = @transform_3, window_bounds = array<i64: 2, 1, 8>}]} {
    %c0_i32 = arith.constant 0 : i32
    %0 = arith.cmpi eq, %arg0, %c0_i32 : i32
    %1 = arith.extui %0 : i1 to i32
    %c0_i32_0 = arith.constant 0 : i32
    %2 = arith.cmpi ne, %1, %c0_i32_0 : i32
    scf.if %2 {
      %cst_19 = arith.constant 0.000000e+00 : f32
      %17 = vector.broadcast %cst_19 : f32 to vector<2x1x8xf32>
      %c0_20 = arith.constant 0 : index
      %c0_21 = arith.constant 0 : index
      %c0_22 = arith.constant 0 : index
      %18 = vector.load %arg3[%c0_20, %c0_21, %c0_22] : memref<2x1x8xf32, #tpu.memory_space<vmem>>, vector<2x1x8xf32>
      tpu.vector_store %arg3[%c0_20, %c0_21, %c0_22], %17 {strides = array<i32>} : memref<2x1x8xf32, #tpu.memory_space<vmem>>, vector<2x1x8xf32>,
      %cst_23 = arith.constant 0.000000e+00 : f32
      %19 = vector.broadcast %cst_23 : f32 to vector<2x1x8xf32>
      %c0_24 = arith.constant 0 : index
      %c0_25 = arith.constant 0 : index
      %c0_26 = arith.constant 0 : index
      %20 = vector.load %arg4[%c0_24, %c0_25, %c0_26] : memref<2x1x8xf32, #tpu.memory_space<vmem>>, vector<2x1x8xf32>
      tpu.vector_store %arg4[%c0_24, %c0_25, %c0_26], %19 {strides = array<i32>} : memref<2x1x8xf32, #tpu.memory_space<vmem>>, vector<2x1x8xf32>,
    } else {
    }
    %c0 = arith.constant 0 : index
    %c0_1 = arith.constant 0 : index
    %c0_2 = arith.constant 0 : index
    %3 = vector.load %arg1[%c0, %c0_1, %c0_2] : memref<2x64x8xf32, #tpu.memory_space<vmem>>, vector<2x64x8xf32>
    %c0_3 = arith.constant 0 : index
    %c0_4 = arith.constant 0 : index
    %c0_5 = arith.constant 0 : index
    %4 = vector.load %arg2[%c0_3, %c0_4, %c0_5] : memref<2x64x8xf32, #tpu.memory_space<vmem>>, vector<2x64x8xf32>
    %c0_6 = arith.constant 0 : index
    %c0_7 = arith.constant 0 : index
    %c0_8 = arith.constant 0 : index
    %5 = vector.load %arg3[%c0_6, %c0_7, %c0_8] : memref<2x1x8xf32, #tpu.memory_space<vmem>>, vector<2x1x8xf32>
    %6 = arith.mulf %3, %4 : vector<2x64x8xf32>
    %7 = math.absf %6 : vector<2x64x8xf32>
    %cst = arith.constant dense<0.000000e+00> : vector<2x8xf32>
    %8 = vector.multi_reduction <add>, %7, %cst [1] : vector<2x64x8xf32> to vector<2x8xf32>
    %9 = vector.shape_cast %8 : vector<2x8xf32> to vector<2x1x8xf32>
    %10 = arith.addf %5, %9 : vector<2x1x8xf32>
    %c0_9 = arith.constant 0 : index
    %c0_10 = arith.constant 0 : index
    %c0_11 = arith.constant 0 : index
    %11 = vector.load %arg3[%c0_9, %c0_10, %c0_11] : memref<2x1x8xf32, #tpu.memory_space<vmem>>, vector<2x1x8xf32>
    tpu.vector_store %arg3[%c0_9, %c0_10, %c0_11], %10 {strides = array<i32>} : memref<2x1x8xf32, #tpu.memory_space<vmem>>, vector<2x1x8xf32>,
    %c0_12 = arith.constant 0 : index
    %c0_13 = arith.constant 0 : index
    %c0_14 = arith.constant 0 : index
    %12 = vector.load %arg4[%c0_12, %c0_13, %c0_14] : memref<2x1x8xf32, #tpu.memory_space<vmem>>, vector<2x1x8xf32>
    %cst_15 = arith.constant dense<0.000000e+00> : vector<2x8xf32>
    %13 = vector.multi_reduction <add>, %4, %cst_15 [1] : vector<2x64x8xf32> to vector<2x8xf32>
    %14 = vector.shape_cast %13 : vector<2x8xf32> to vector<2x1x8xf32>
    %15 = arith.addf %12, %14 : vector<2x1x8xf32>
    %c0_16 = arith.constant 0 : index
    %c0_17 = arith.constant 0 : index
    %c0_18 = arith.constant 0 : index
    %16 = vector.load %arg4[%c0_16, %c0_17, %c0_18] : memref<2x1x8xf32, #tpu.memory_space<vmem>>, vector<2x1x8xf32>
    tpu.vector_store %arg4[%c0_16, %c0_17, %c0_18], %15 {strides = array<i32>} : memref<2x1x8xf32, #tpu.memory_space<vmem>>, vector<2x1x8xf32>,
    return
  }
  func.func @transform_0(%arg0: i32) -> (i32, i32, i32) {
    %c0_i32 = arith.constant 0 : i32
    %c0_i32_0 = arith.constant 0 : i32
    %c0_i32_1 = arith.constant 0 : i32
    return %c0_i32, %arg0, %c0_i32_0 : i32, i32, i32
  }
  func.func @transform_1(%arg0: i32) -> (i32, i32, i32) {
    %c0_i32 = arith.constant 0 : i32
    %c0_i32_0 = arith.constant 0 : i32
    %c0_i32_1 = arith.constant 0 : i32
    return %c0_i32, %arg0, %c0_i32_0 : i32, i32, i32
  }
  func.func @transform_2(%arg0: i32) -> (i32, i32, i32) {
    %c0_i32 = arith.constant 0 : i32
    %c0_i32_0 = arith.constant 0 : i32
    %c0_i32_1 = arith.constant 0 : i32
    %c0_i32_2 = arith.constant 0 : i32
    return %c0_i32, %c0_i32_0, %c0_i32_1 : i32, i32, i32
  }
  func.func @transform_3(%arg0: i32) -> (i32, i32, i32) {
    %c0_i32 = arith.constant 0 : i32
    %c0_i32_0 = arith.constant 0 : i32
    %c0_i32_1 = arith.constant 0 : i32
    %c0_i32_2 = arith.constant 0 : i32
    return %c0_i32, %c0_i32_0, %c0_i32_1 : i32, i32, i32
  }
}

</mosaic_0001>

<bundles_post_ra>
// kernel: tpu_custom_call.1
= control target key start
LH: loop header
LB: loop body
LE: loop exit
PB: predicated region body
PF: predicated region fallthrough
CT: control target
= control target key end

     0   :  { %9 = vsyncpa [#allocation3], 0  ;;  %vm19_vm0 = vcmask 57344   ;;  %vm90_vm1 = vcmask 64512   ;;  %v271_v3 = vmov 0.0   ;;  %s476_s0 = inlined_call_operand.vmem [shape: f32[2,64,8], index: 0, kind: input, shape index: {}]   ;;  %s477_s1 = inlined_call_operand.vmem [shape: f32[2,64,8], index: 1, kind: input, shape index: {}]   ;;  %s478_s2 = inlined_call_operand.hbm [shape: f32[2,1,8], index: 2, kind: output, shape index: {0}]   ;;  %s479_s3 = inlined_call_operand.hbm [shape: f32[2,1,8], index: 3, kind: output, shape index: {1}]  }
   0x1   :  { %v24_v0 = vld [vmem:[%s476_s0] sm:$0xff]  ;;  %v25_v1 = vld [vmem:[%s476_s0 + $0x8] sm:$0xff]  ;;  %v26_v2 = vld [vmem:[%s476_s0 + $0x10] sm:$0xff]  ;;  %20 = vst.msk [vmem:[#allocation2] sm:$0x1] %vm19_vm0, %v271_v3 }
   0x2   :  { %21 = vst.msk [vmem:[#allocation2 + $0x1] sm:$0x1] %vm19_vm0, %v271_v3  ;;  %22 = vst.msk [vmem:[#allocation4] sm:$0x1] %vm19_vm0, %v271_v3  ;;  %v27_v4 = vld [vmem:[%s476_s0 + $0x18] sm:$0xff]  ;;  %v28_v5 = vld [vmem:[%s476_s0 + $0x20] sm:$0xff] }
   0x3   :  { %23 = vst.msk [vmem:[#allocation4 + $0x1] sm:$0x1] %vm19_vm0, %v271_v3  ;;  %v29_v6 = vld [vmem:[%s476_s0 + $0x28] sm:$0xff]  ;;  %v30_v7 = vld [vmem:[%s476_s0 + $0x30] sm:$0xff]  ;;  %v31_v8 = vld [vmem:[%s476_s0 + $0x38] sm:$0xff] }
   0x4   :  { %v40_v9 = vld [vmem:[%s477_s1] sm:$0xff]  ;;  %v41_v10 = vld [vmem:[%s477_s1 + $0x8] sm:$0xff]  ;;  %v42_v11 = vld [vmem:[%s477_s1 + $0x10] sm:$0xff] }
   0x5   :  { %v43_v12 = vld [vmem:[%s477_s1 + $0x18] sm:$0xff]  ;;  %v58_v13 = vmul.f32 %v40_v9, %v24_v0  ;;  %v140_v14 = vsel %vm90_vm1, %v40_v9, 0.0  ;;  %v340_v15 = vld [vmem:[%s477_s1 + $0x20] sm:$0xff]  ;;  %v345_v16 = vld [vmem:[%s477_s1 + $0x28] sm:$0xff]  ;;  %v59_v18 = vmul.f32 %v41_v10, %v25_v1  ;;  %v60_v19 = vmul.f32 %v42_v11, %v26_v2 }
   0x6   :  { %v350_v17 = vld [vmem:[%s477_s1 + $0x30] sm:$0xff]  ;;  %v61_v20 = vmul.f32 %v43_v12, %v27_v4  ;;  %v141_v21 = vsel %vm90_vm1, %v41_v10, 0.0  ;;  %v356_v22 = vld [vmem:[%s477_s1 + $0x38] sm:$0xff]  ;;  %v62_v23 = vmul.f32 %v340_v15, %v28_v5  ;;  %v63_v24 = vmul.f32 %v345_v16, %v29_v6  ;;  %v32_v36 = vld [vmem:[%s476_s0 + $0x40] sm:$0xff] }
   0x7   :  { %v64_v25 = vmul.f32 %v350_v17, %v30_v7  ;;  %v74_v26 = vand.u32 2147483647, %v58_v13  ;;  %v65_v27 = vmul.f32 %v356_v22, %v31_v8  ;;  %v75_v28 = vand.u32 2147483647, %v59_v18  ;;  %v33_v37 = vld [vmem:[%s476_s0 + $0x48] sm:$0xff]  ;;  %v34_v42 = vld [vmem:[%s476_s0 + $0x50] sm:$0xff] }
   0x8   :  { %v76_v29 = vand.u32 2147483647, %v60_v19  ;;  %v77_v30 = vand.u32 2147483647, %v61_v20  ;;  %v78_v31 = vand.u32 2147483647, %v62_v23  ;;  %v142_v38 = vadd.f32 %v141_v21, %v140_v14 }
   0x9   :  { %v79_v32 = vand.u32 2147483647, %v63_v24  ;;  %v80_v33 = vand.u32 2147483647, %v64_v25  ;;  %v91_v34 = vsel %vm90_vm1, %v74_v26, 0.0  ;;  %v92_v35 = vsel %vm90_vm1, %v75_v28, 0.0 }
   0xa   :  { %v81_v39 = vand.u32 2147483647, %v65_v27  ;;  %v93_v40 = vadd.f32 %v92_v35, %v91_v34  ;;  %v94_v41 = vsel %vm90_vm1, %v76_v29, 0.0  ;;  %v35_v43 = vld [vmem:[%s476_s0 + $0x58] sm:$0xff]  ;;  %v36_v44 = vld [vmem:[%s476_s0 + $0x60] sm:$0xff]  ;;  %v96_v45 = vsel %vm90_vm1, %v77_v30, 0.0 }
   0xb   :  { %v98_v46 = vsel %vm90_vm1, %v78_v31, 0.0  ;;  %v37_v47 = vld [vmem:[%s476_s0 + $0x68] sm:$0xff]  ;;  %v38_v48 = vld [vmem:[%s476_s0 + $0x70] sm:$0xff]  ;;  %v39_v49 = vld [vmem:[%s476_s0 + $0x78] sm:$0xff]  ;;  %v100_v51 = vsel %vm90_vm1, %v79_v32, 0.0  ;;  %v102_v52 = vsel %vm90_vm1, %v80_v33, 0.0 }
   0xc   :  { %v95_v50 = vadd.f32 %v94_v41, %v93_v40  ;;  %v48_v53 = vld [vmem:[%s477_s1 + $0x40] sm:$0xff]  ;;  %v49_v54 = vld [vmem:[%s477_s1 + $0x48] sm:$0xff]  ;;  %v50_v55 = vld [vmem:[%s477_s1 + $0x50] sm:$0xff]  ;;  %v143_v56 = vsel %vm90_vm1, %v42_v11, 0.0  ;;  %v145_v5 = vsel %vm90_vm1, %v43_v12, 0.0  ;;  %v104_v18 = vsel %vm90_vm1, %v81_v39, 0.0 }
   0xd   :  { %v51_v57 = vld [vmem:[%s477_s1 + $0x58] sm:$0xff]  ;;  %v52_v58 = vld [vmem:[%s477_s1 + $0x60] sm:$0xff]  ;;  %v53_v59 = vld [vmem:[%s477_s1 + $0x68] sm:$0xff]  ;;  %v66_v60 = vmul.f32 %v48_v53, %v32_v36  ;;  %v67_v61 = vmul.f32 %v49_v54, %v33_v37  ;;  %v68_v62 = vmul.f32 %v50_v55, %v34_v42  ;;  %v144_v63 = vadd.f32 %v143_v56, %v142_v38 }
   0xe   :  { %v97_v0 = vadd.f32 %v96_v45, %v95_v50  ;;  %v54_v1 = vld [vmem:[%s477_s1 + $0x70] sm:$0xff]  ;;  %v418_v2 = vld [vmem:[%s477_s1 + $0x78] sm:$0xff]  ;;  %v69_v3 = vmul.f32 %v51_v57, %v35_v43  ;;  %v70_v4 = vmul.f32 %v52_v58, %v36_v44  ;;  %v71_v6 = vmul.f32 %v53_v59, %v37_v47 }
   0xf   :  { %v72_v7 = vmul.f32 %v54_v1, %v38_v48  ;;  %v82_v8 = vand.u32 2147483647, %v66_v60  ;;  %v83_v9 = vand.u32 2147483647, %v67_v61  ;;  %v73_v11 = vmul.f32 %v418_v2, %v39_v49 }
  0x10   :  { %v99_v10 = vadd.f32 %v98_v46, %v97_v0  ;;  %v84_v13 = vand.u32 2147483647, %v68_v62  ;;  %v85_v14 = vand.u32 2147483647, %v69_v3  ;;  %v86_v19 = vand.u32 2147483647, %v70_v4 }
  0x11   :  { %v146_v20 = vadd.f32 %v145_v5, %v144_v63  ;;  %v147_v21 = vsel %vm90_vm1, %v340_v15, 0.0  ;;  %v112_v24 = vsel %vm90_vm1, %v82_v8, 0.0  ;;  %v113_v12 = vsel %vm90_vm1, %v83_v9, 0.0 }
  0x12   :  { %v101_v23 = vadd.f32 %v100_v51, %v99_v10  ;;  %v115_v25 = vsel %vm90_vm1, %v84_v13, 0.0  ;;  %v87_v26 = vand.u32 2147483647, %v71_v6  ;;  %v88_v27 = vand.u32 2147483647, %v72_v7 }
  0x13   :  { %v114_v28 = vadd.f32 %v113_v12, %v112_v24 }
  0x14   :  { %10 = vsyncpa [#allocation5], 0  ;;  %v103_v29 = vadd.f32 %v102_v52, %v101_v23  ;;  %v89_v30 = vand.u32 2147483647, %v73_v11  ;;  %v117_v31 = vsel %vm90_vm1, %v85_v14, 0.0  ;;  %v148_v32 = vadd.f32 %v147_v21, %v146_v20  ;;  %s272_s1 = smov [#allocation2]  }
  0x15   :  { %v116_v33 = vadd.f32 %v115_v25, %v114_v28  ;;  %v119_v34 = vsel %vm90_vm1, %v86_v19, 0.0  ;;  %v149_v15 = vsel %vm90_vm1, %v345_v16, 0.0  ;;  %v151_v35 = vsel %vm90_vm1, %v350_v17, 0.0  ;;  %v56_v6 = vld [vmem:[#allocation2] sm:$0x1]  ;;  %s191_s21 = sshll.u32 %s272_s1, 4  ;;  %s192_s21 = int_to_ptr.vmem [resolvable:$true] %s191_s21 }
  0x16   :  { %v105_v36 = vadd.f32 %v104_v18, %v103_v29  ;;  %v150_v37 = vadd.f32 %v149_v15, %v148_v32  ;;  %v161_v38 = vsel %vm90_vm1, %v48_v53, 0.0  ;;  %v162_v39 = vsel %vm90_vm1, %v49_v54, 0.0  ;;  %v138_v19 = vld [vmem:[#allocation4] sm:$0x1]  ;;  %v57_v25 = vld [vmem:[#allocation2 + $0x1] sm:$0x1]  ;;  %p228_p1 = scmp.lt.s32.totalorder %s192_s21, %s192_s21 }
  0x17   :  { %v118_v40 = vadd.f32 %v117_v31, %v116_v33  ;;  %v153_v41 = vsel %vm90_vm1, %v356_v22, 0.0  ;;  %v163_v42 = vadd.f32 %v162_v39, %v161_v38  ;;  %v164_v43 = vsel %vm90_vm1, %v50_v55, 0.0  ;;  %s273_s22 = smov [#allocation4]   ;;  %s223_s24 = scalar_lea.vmem %s192_s21, 32 }
  0x18   :  { %v106_v44 = vrot.slane %v105_v36, 4  ;;  %v121_v45 = vsel %vm90_vm1, %v87_v26, 0.0  ;;  %v152_v16 = vadd.f32 %v151_v35, %v150_v37  ;;  %v166_v46 = vsel %vm90_vm1, %v51_v57, 0.0  ;;  %s203_s23 = sshll.u32 %s273_s22, 4  ;;  %p224_p0 = scmp.ne.s32.totalorder %s192_s21, %s223_s24  ;;  %s204_s23 = int_to_ptr.vmem [resolvable:$true] %s203_s23 }
  0x19   :  { %v120_v17 = vadd.f32 %v119_v34, %v118_v40  ;;  %v165_v47 = vadd.f32 %v164_v43, %v163_v42  ;;  %v123_v49 = vsel %vm90_vm1, %v88_v27, 0.0  ;;  %v168_v51 = vsel %vm90_vm1, %v52_v58, 0.0  ;;  %p229_p2 = scmp.lt.s32.totalorder %s223_s24, %s223_s24 }
  0x1a   :  { %v107_v48 = vadd.f32 %v106_v44, %v105_v36  ;;  %v154_v50 = vadd.f32 %v153_v41, %v152_v16  ;;  %v125_v54 = vsel %vm90_vm1, %v89_v30, 0.0  ;;  %v170_v56 = vsel %vm90_vm1, %v53_v59, 0.0  ;;  %v139_v30 = vld [vmem:[#allocation4 + $0x1] sm:$0x1] }
  0x1b   :  { %v122_v52 = vadd.f32 %v121_v45, %v120_v17  ;;  %v167_v53 = vadd.f32 %v166_v46, %v165_v47  ;;  %v172_v63 = vsel %vm90_vm1, %v54_v1, 0.0  ;;  %v174_v58 = vsel %vm90_vm1, %v418_v2, 0.0  ;;  %p230_p3 = por %p229_p2, %p228_p1 }
  0x1c   :  { %v108_v22 = vrot.slane %v107_v48, 2  ;;  %v155_v55 = vrot.slane %v154_v50, 4 }
  0x1d   :  { %v124_v60 = vadd.f32 %v123_v49, %v122_v52  ;;  %v169_v61 = vadd.f32 %v168_v51, %v167_v53  ;;  %p231_p4 = pnand %p230_p3, %p224_p0 }
  0x1e   :  { %v109_v62 = vadd.f32 %v108_v22, %v107_v48  ;;  %v156_v57 = vadd.f32 %v155_v55, %v154_v50 }
  0x1f   :  { %v126_v0 = vadd.f32 %v125_v54, %v124_v60  ;;  %v171_v3 = vadd.f32 %v170_v56, %v169_v61 }
  0x20   :  { %v110_v4 = vrot.slane %v109_v62, 1  ;;  %v157_v5 = vrot.slane %v156_v57, 2 }
  0x21   :  { %v127_v7 = vrot.slane %v126_v0, 4  ;;  %v173_v8 = vadd.f32 %v172_v63, %v171_v3 }
  0x22   :  { %v111_v9 = vadd.f32 %v110_v4, %v109_v62  ;;  %v158_v10 = vadd.f32 %v157_v5, %v156_v57 }
  0x23   :  { %v128_v11 = vadd.f32 %v127_v7, %v126_v0  ;;  %v175_v59 = vadd.f32 %v174_v58, %v173_v8 }
  0x24   :  { %v133_v13 = vadd.f32 %v111_v9, %v56_v6  ;;  %v159_v14 = vrot.slane %v158_v10, 1 }
  0x25   :  { %v129_v18 = vrot.slane %v128_v11, 2  ;;  %v176_v20 = vrot.slane %v175_v59, 4 }
  0x26   :  { %136 = vst.msk [vmem:[#allocation2] sm:$0x1] %vm19_vm0, %v133_v13  ;;  %v160_v1 = vadd.f32 %v159_v14, %v158_v10 }
  0x27   :  { %v130_v21 = vadd.f32 %v129_v18, %v128_v11  ;;  %v177_v23 = vadd.f32 %v176_v20, %v175_v59 }
  0x28   :  { %v182_v24 = vadd.f32 %v160_v1, %v138_v19 }
  0x29   :  { %v131_v12 = vrot.slane %v130_v21, 1  ;;  %v178_v2 = vrot.slane %v177_v23, 2 }
  0x2a   :  { %184 = vst.msk [vmem:[#allocation4] sm:$0x1] %vm19_vm0, %v182_v24 }
  0x2b   :  { %v132_v26 = vadd.f32 %v131_v12, %v130_v21  ;;  %v179_v27 = vadd.f32 %v178_v2, %v177_v23 }
  0x2d   :  { %v134_v28 = vadd.f32 %v132_v26, %v57_v25  ;;  %v180_v29 = vrot.slane %v179_v27, 1 }
  0x2f   :  { %137 = vst.msk [vmem:[#allocation2 + $0x1] sm:$0x1] %vm19_vm0, %v134_v28  ;;  %v181_v31 = vadd.f32 %v180_v29, %v179_v27 }
  0x30   :  { %234 = shalt.err (!%p231_p4)
}
  0x31   :  { %s235_s27 = scalar_lea.hbm %s478_s2, 32 }
  0x32   :  { %p236_p5 = scmp.ne.s32.totalorder %s478_s2, %s235_s27  ;;  %p239_p6 = scmp.lt.u32.totalorder %s235_s27, %s478_s2 }
  0x34   :  { %p241_p7 = pnand %p239_p6, %p236_p5 }
  0x36   :  { %244 = shalt.err (!%p241_p7)
}
  0x37   :  { %s274_s5 = smov 16   ;;  %s275_s6 = smov 1   ;;  %v183_v32 = vadd.f32 %v181_v31, %v139_v30 }
  0x38   :  { %197 = dma.vmem_to_hbm [thread:$0]  %s192_s21, 32, %s478_s2, [#allocation3], %s274_s5, %s274_s5, %s275_s6  }
  0x39   :  { %185 = vst.msk [vmem:[#allocation4 + $0x1] sm:$0x1] %vm19_vm0, %v183_v32  ;;  %s245_s9 = scalar_lea.vmem %s204_s23, 32  ;;  %p250_p9 = scmp.lt.s32.totalorder %s204_s23, %s204_s23 }
  0x3a   :  { %p246_p8 = scmp.ne.s32.totalorder %s204_s23, %s245_s9  ;;  %p251_p10 = scmp.lt.s32.totalorder %s245_s9, %s245_s9 }
  0x3c   :  { %p252_p11 = por %p251_p10, %p250_p9 }
  0x3e   :  { %p253_p12 = pnand %p252_p11, %p246_p8 }
  0x40   :  { %256 = shalt.err (!%p253_p12)
}
  0x41   :  { %s257_s0 = scalar_lea.hbm %s479_s3, 32 }
  0x42   :  { %p258_p13 = scmp.ne.s32.totalorder %s479_s3, %s257_s0  ;;  %p261_p0 = scmp.lt.u32.totalorder %s257_s0, %s479_s3 }
  0x44   :  { %p263_p1 = pnand %p261_p0, %p258_p13 }
  0x46   :  { %266 = shalt.err (!%p263_p1)
}
  0x47   :  { %209 = dma.vmem_to_hbm [thread:$0]  %s204_s23, 32, %s479_s3, [#allocation5], %s274_s5, %s274_s5, %s275_s6  }
  0x48   :  { %267 = dma.done.wait [#allocation3], 32  }
  0x49   :  { %268 = vsyncadd [#allocation3], 4294967264 }
  0x4a   :  { %269 = dma.done.wait [#allocation5], 32  }
  0x4b   :  { %270 = vsyncadd [#allocation5], 4294967264 }
  0x4c   :  { %216 = vsyncpa [#allocation3], 1 }
  0x4d   :  { %217 = vsyncpa [#allocation5], 1 }

</bundles_post_ra>
